<compile_context>
chip_gen: v5e
topology: v5e:2x2
jax: 0.10.0
libtpu: 0.0.40
codegen_flags: <defaults>
</compile_context>

<pallas_src>
import jax
import jax.numpy as jnp
from jax import lax
from jax.experimental import pallas as pl
from jax.experimental.pallas import tpu as pltpu

BN_EPS = 1e-5


def _round_up(a, b):
    return ((a + b - 1) // b) * b


def _tile_m_cap_and_cores():
    """Per-generation tile_m cap sized against the default scoped-VMEM limit.

    Live VMEM per step ~= tile_m * 512B (x, lane-padded to 128) * 2 buffers
                        + tile_m * 512B (h, hidden=32 lane-padded to 128).
    """
    try:
        kind = jax.devices()[0].device_kind.lower()
    except Exception:
        kind = ""
    if "v6" in kind:
        return 16384, 1   # 32 MiB default scoped VMEM, 1 TensorCore
    if "v7" in kind:
        return 8192, 2    # 64 MiB physical VMEM, 2 TensorCores -> keep >= 2 tiles
    return 4096, 1        # v5e (16 MiB default scoped VMEM) / older / unknown


def mlp_kernel(x_ref, w1_ref, b1_ref, w2_ref, b2_ref, o_ref):
    # x_ref:  (tile_m, k)   -- one pipelined block of input rows
    # w1_ref: (k, hidden)   -- BN-folded fc1 weight, VMEM-resident (constant index map)
    # b1_ref: (1, hidden)   -- BN-folded fc1 bias
    # w2_ref: (1, hidden)   -- fc2 weight row (torch layout)
    # b2_ref: (1, 1)        -- fc2 bias scalar in SMEM
    # o_ref:  (1, tile_m)   -- lane-dense output row block

    # fc1 (+ folded BatchNorm) + ReLU on the MXU, f32 accumulate.
    h = jnp.dot(x_ref[...], w1_ref[...], preferred_element_type=jnp.float32)
    h = jnp.maximum(h + b1_ref[...], 0.0)                       # (tile_m, hidden)

    # fc2 as w2 . h^T -> (1, tile_m): result lands lane-dense.
    y = lax.dot_general(
        w2_ref[...], h,
        dimension_numbers=(((1,), (1,)), ((), ())),
        preferred_element_type=jnp.float32,
    )                                                            # (1, tile_m)
    o_ref[...] = y + b2_ref[0, 0]


@jax.jit
def two_layer_mlp(x, gamma, beta, w1, b1, w2, b2):
    """x: (B, N, k) float32 -> (B, N) float32."""
    B, N, k = x.shape
    hidden = w1.shape[1]
    M = B * N
    x2 = x.reshape(M, k).astype(jnp.float32)

    # ---- BatchNorm (training-mode batch stats, biased var) folded into fc1.
    # Single fused pass: mean and E[x^2] from one read of x; clamp variance.
    mean = jnp.mean(x2, axis=0)                                  # (k,)
    ex2 = jnp.mean(x2 * x2, axis=0)                              # (k,)
    var = jnp.maximum(ex2 - mean * mean, 0.0)                    # biased variance
    inv_std = lax.rsqrt(var + BN_EPS)
    scale = gamma.reshape(-1) * inv_std                          # (k,)
    shift = beta.reshape(-1) - mean * scale                      # (k,)
    w1f = w1 * scale[:, None]                                    # (k, hidden)
    b1f = b1.reshape(1, hidden) + (shift @ w1).reshape(1, hidden)

    # ---- Tiling over M (rows are independent once BN is folded).
    # No full-array pad: only tiny-M inputs get padded to one 128-wide block;
    # otherwise pl.cdiv grid + Pallas partial-last-block masking handles the tail.
    if M < 128:
        Mp = 128
        x2 = jnp.pad(x2, ((0, Mp - M), (0, 0)))                  # negligible copy
    else:
        Mp = M

    cap, n_cores = _tile_m_cap_and_cores()
    tile_m = min(cap, _round_up(Mp, 128))                        # multiple of 128
    if n_cores > 1:
        # keep >= 2 grid steps so both TensorCores get work on v7x
        tile_m = min(tile_m, max(128, _round_up(pl.cdiv(Mp, n_cores), 128)))
    num_tiles = pl.cdiv(Mp, tile_m)

    # TODO(synk): if x can arrive in bf16 end-to-end, feed it as bf16 (keep BN
    # stats in f32) to halve the dominant HBM read; do NOT add a standalone cast.
    # TODO(synk): for even bigger tiles, pack g=128//k rows into 128-lane rows
    # with block-diagonal folded weights to kill the 8x lane padding of x.
    out = pl.pallas_call(
        mlp_kernel,
        out_shape=jax.ShapeDtypeStruct((1, Mp), jnp.float32),
        grid=(num_tiles,),
        in_specs=[
            pl.BlockSpec((tile_m, k), lambda i: (i, 0)),         # x block, double-buffered
            pl.BlockSpec((k, hidden), lambda i: (0, 0)),         # w1f, resident
            pl.BlockSpec((1, hidden), lambda i: (0, 0)),         # b1f, resident
            pl.BlockSpec((1, hidden), lambda i: (0, 0)),         # w2 row, resident
            pl.BlockSpec(memory_space=pltpu.MemorySpace.SMEM),   # b2 scalar
        ],
        out_specs=pl.BlockSpec((1, tile_m), lambda i: (0, i)),   # lane-dense output row
        compiler_params=pltpu.CompilerParams(
            dimension_semantics=("parallel",),
        ),
    )(x2, w1f, b1f, w2, b2)

    return out[0, :M].reshape(B, N)


def init_params(key, k, hidden_dim):
    """Deterministic init matching the module's __init__:
       xavier_normal on fc weights, zeros on fc biases, BatchNorm affine = (1, 0)."""
    k1, k2 = jax.random.split(key)

    # fc1: torch weight shape (hidden, k); xavier normal std = sqrt(2 / (fan_in + fan_out))
    std1 = (2.0 / (k + hidden_dim)) ** 0.5
    w1_t = jax.random.normal(k1, (hidden_dim, k), dtype=jnp.float32) * std1
    w1 = w1_t.T                                   # (k, hidden) for row-major matmul
    b1 = jnp.zeros((1, hidden_dim), dtype=jnp.float32)

    # fc2: torch weight shape (1, hidden) -- kept in that layout (kernel wants the row)
    std2 = (2.0 / (hidden_dim + 1)) ** 0.5
    w2 = jax.random.normal(k2, (1, hidden_dim), dtype=jnp.float32) * std2
    b2 = jnp.zeros((1, 1), dtype=jnp.float32)

    # BatchNorm1d(k) affine parameters (default init)
    gamma = jnp.ones((1, k), dtype=jnp.float32)
    beta = jnp.zeros((1, k), dtype=jnp.float32)
    return gamma, beta, w1, b1, w2, b2


def reference_forward(x, gamma, beta, w1, b1, w2, b2):
    """Pure-JAX reference (training-mode BatchNorm, dropout disabled)."""
    B, N, k = x.shape
    x2 = x.reshape(-1, k)
    mean = jnp.mean(x2, axis=0, keepdims=True)
    var = jnp.mean((x2 - mean) ** 2, axis=0, keepdims=True)
    xn = (x2 - mean) / jnp.sqrt(var + BN_EPS) * gamma + beta
    h = jnp.maximum(xn @ w1 + b1, 0.0)
    y = h @ w2.T + b2
    return y.reshape(B, N)


if __name__ == "__main__":
    B, N, K, HIDDEN = 2, 8, 16, 32

    key = jax.random.PRNGKey(0)
    kx, kp = jax.random.split(key)
    x = jax.random.normal(kx, (B, N, K), dtype=jnp.float32)
    params = init_params(kp, K, HIDDEN)

    y = two_layer_mlp(x, *params)
    y = jax.block_until_ready(y)

    y_ref = reference_forward(x, *params)
    assert y.shape == (B, N)
    # BN is folded into W1/b1 (single-pass E[x^2]-mean^2 variance, rsqrt, different
    # summation order), so allow a slightly looser tolerance than bit-exact.
    assert jnp.allclose(y, y_ref, atol=1e-4, rtol=1e-4), "mismatch vs reference"

    print("KERNEL_OK")
</pallas_src>

<mosaic_0001>
module attributes {stable_mosaic.version = 11 : i64} {
  func.func @mlp_kernel(%arg0: i32, %arg1: memref<128x16xf32, #tpu.memory_space<vmem>>, %arg2: memref<16x32xf32, #tpu.memory_space<vmem>>, %arg3: memref<1x32xf32, #tpu.memory_space<vmem>>, %arg4: memref<1x32xf32, #tpu.memory_space<vmem>>, %arg5: memref<1x1xf32, #tpu.memory_space<smem>>, %arg6: memref<1x128xf32, #tpu.memory_space<vmem>>) attributes {dimension_semantics = [#tpu.dimension_semantics<parallel>], iteration_bounds = array<i64: 1>, scalar_prefetch = 0 : i64, scratch_operands = 0 : i64, tpu.core_type = #tpu.core_type<tc>, window_params = [{transform_indices = @transform_0, window_bounds = array<i64: 128, 16>}, {pipeline_mode = #tpu.pipeline_mode<synchronous>, transform_indices = @transform_1, window_bounds = array<i64: 16, 32>}, {pipeline_mode = #tpu.pipeline_mode<synchronous>, transform_indices = @transform_2, window_bounds = array<i64: 1, 32>}, {pipeline_mode = #tpu.pipeline_mode<synchronous>, transform_indices = @transform_3, window_bounds = array<i64: 1, 32>}, {transform_indices = @transform_4, window_bounds = array<i64: 1, 1>}, {transform_indices = @transform_5, window_bounds = array<i64: 1, 128>}]} {
    %c0 = arith.constant 0 : index
    %c0_0 = arith.constant 0 : index
    %0 = vector.load %arg1[%c0, %c0_0] : memref<128x16xf32, #tpu.memory_space<vmem>>, vector<128x16xf32>
    %c0_1 = arith.constant 0 : index
    %c0_2 = arith.constant 0 : index
    %1 = vector.load %arg2[%c0_1, %c0_2] : memref<16x32xf32, #tpu.memory_space<vmem>>, vector<16x32xf32>
    %cst = arith.constant dense<0.000000e+00> : vector<128x32xf32>
    %2 = tpu.matmul %0, %1, %cst {dimension_numbers = #tpu.dot_dimension_numbers<[1], [0], [0], [1], [0, 0, 1, 1], [], []>} : vector<128x16xf32>, vector<16x32xf32>, vector<128x32xf32> -> vector<128x32xf32>
    %c0_3 = arith.constant 0 : index
    %c0_4 = arith.constant 0 : index
    %3 = vector.load %arg3[%c0_3, %c0_4] : memref<1x32xf32, #tpu.memory_space<vmem>>, vector<1x32xf32>
    %4 = vector.broadcast %3 : vector<1x32xf32> to vector<128x32xf32>
    %5 = arith.addf %2, %4 : vector<128x32xf32>
    %cst_5 = arith.constant 0.000000e+00 : f32
    %6 = vector.broadcast %cst_5 : f32 to vector<128x32xf32>
    %7 = arith.maximumf %5, %6 : vector<128x32xf32>
    %c0_6 = arith.constant 0 : index
    %c0_7 = arith.constant 0 : index
    %8 = vector.load %arg4[%c0_6, %c0_7] : memref<1x32xf32, #tpu.memory_space<vmem>>, vector<1x32xf32>
    %cst_8 = arith.constant dense<0.000000e+00> : vector<1x128xf32>
    %9 = tpu.matmul %8, %7, %cst_8 {dimension_numbers = #tpu.dot_dimension_numbers<[1], [1], [0], [0], [0, 0, 1, 0], [], []>} : vector<1x32xf32>, vector<128x32xf32>, vector<1x128xf32> -> vector<1x128xf32>
    %c0_9 = arith.constant 0 : index
    %c0_10 = arith.constant 0 : index
    %10 = memref.load %arg5[%c0_9, %c0_10] : memref<1x1xf32, #tpu.memory_space<smem>>
    %11 = vector.broadcast %10 : f32 to vector<1x128xf32>
    %12 = arith.addf %9, %11 : vector<1x128xf32>
    %c0_11 = arith.constant 0 : index
    %c0_12 = arith.constant 0 : index
    %13 = vector.load %arg6[%c0_11, %c0_12] : memref<1x128xf32, #tpu.memory_space<vmem>>, vector<1x128xf32>
    tpu.vector_store %arg6[%c0_11, %c0_12], %12 {strides = array<i32>} : memref<1x128xf32, #tpu.memory_space<vmem>>, vector<1x128xf32>,
    return
  }
  func.func @transform_0(%arg0: i32) -> (i32, i32) {
    %c0_i32 = arith.constant 0 : i32
    %c0_i32_0 = arith.constant 0 : i32
    return %arg0, %c0_i32 : i32, i32
  }
  func.func @transform_1(%arg0: i32) -> (i32, i32) {
    %c0_i32 = arith.constant 0 : i32
    %c0_i32_0 = arith.constant 0 : i32
    %c0_i32_1 = arith.constant 0 : i32
    return %c0_i32, %c0_i32_0 : i32, i32
  }
  func.func @transform_2(%arg0: i32) -> (i32, i32) {
    %c0_i32 = arith.constant 0 : i32
    %c0_i32_0 = arith.constant 0 : i32
    %c0_i32_1 = arith.constant 0 : i32
    return %c0_i32, %c0_i32_0 : i32, i32
  }
  func.func @transform_3(%arg0: i32) -> (i32, i32) {
    %c0_i32 = arith.constant 0 : i32
    %c0_i32_0 = arith.constant 0 : i32
    %c0_i32_1 = arith.constant 0 : i32
    return %c0_i32, %c0_i32_0 : i32, i32
  }
  func.func @transform_4(%arg0: i32) -> (i32, i32) {
    %c0_i32 = arith.constant 0 : i32
    %c0_i32_0 = arith.constant 0 : i32
    %c0_i32_1 = arith.constant 0 : i32
    return %c0_i32, %c0_i32_0 : i32, i32
  }
  func.func @transform_5(%arg0: i32) -> (i32, i32) {
    %c0_i32 = arith.constant 0 : i32
    %c0_i32_0 = arith.constant 0 : i32
    return %c0_i32, %arg0 : i32, i32
  }
}

</mosaic_0001>

<bundles_post_ra>
// kernel: squeeze.1
= control target key start
LH: loop header
LB: loop body
LE: loop exit
PB: predicated region body
PF: predicated region fallthrough
CT: control target
= control target key end

     0   :  { %s80_s0 = inlined_call_operand.vmem [shape: f32[16], index: 0, kind: input, shape index: {}]   ;;  %s81_s1 = inlined_call_operand.hbm [shape: f32[2,8], index: 1, kind: output, shape index: {}]  }
   0x1   :  { %v5_v0 = vld [vmem:[%s80_s0] sm:$0x1] }
   0x2   :  { %2 = vsyncpa [#allocation1], 0  ;;  %6 = vst [vmem:[#allocation3] sm:$0x1] %v5_v0  ;;  %vm8_vm0 = vcmask 64512   ;;  %s62_s0 = smov 120  }
   0x3   :  { %s63_s8 = smov [#allocation0]   ;;  %s27_s1 = sshll.u32 %s81_s1, 4  ;;  %s28_s1 = int_to_ptr.hbm [resolvable:$true] %s27_s1 }
   0x4   :  { %s25_s9 = sshll.u32 %s63_s8, 4  ;;  %s26_s9 = int_to_ptr.vmem [resolvable:$true] %s25_s9 }
   0x9   :  { %v10_v1 = vld [vmem:[#allocation3] sm:$0x1]  }
   0xa   :  { %v7_v2 = vld [vmem:[#allocation3] sm:$0x1]   ;;  %11 = vrot.lane.b32.xlu0 %v10_v1, %s62_s0 }
   0xb   :  { %9 = vst.msk [vmem:[#allocation2] sm:$0x1] %vm8_vm0, %v7_v2  }
  0x7c   :  { %v12_v3 = vpop.permute.xlu0 %11  }
  0x7d   :  { %15 = vst.msk [vmem:[#allocation2 + $0x1] sm:$0x1] %vm8_vm0, %v12_v3  }
  0x84   :  { %v18_v4 = vld [vmem:[#allocation2] sm:$0x3] }
  0x85   :  { %21 = vst [vmem:[#allocation0] sm:$0x3] %v18_v4 }
  0x86   :  { %30 = dma.vmem_to_hbm [thread:$0]  %s26_s9, 32, %s28_s1, [#allocation1]  }
  0x87   :  { %60 = dma.done.wait [#allocation1], 32  }
  0x88   :  { %61 = vsyncadd [#allocation1], 4294967264 }
  0x89   :  { %33 = vsyncpa [#allocation1], 1 }

// kernel: two_layer_mlp.1
= control target key start
LH: loop header
LB: loop body
LE: loop exit
PB: predicated region body
PF: predicated region fallthrough
CT: control target
= control target key end

     0   :  { %vm43_vm0 = vcmask 130048   ;;  %vm176_vm1 = vcmask 261120   ;;  %s420_s1 = inlined_call_operand.vmem [shape: f32[16,32], index: 1, kind: input, shape index: {}]   ;;  %s421_s0 = inlined_call_operand.vmem [shape: f32[128,16], index: 0, kind: input, shape index: {}]   ;;  %s422_s2 = inlined_call_operand.vmem [shape: f32[1,32], index: 2, kind: input, shape index: {}]   ;;  %s423_s3 = inlined_call_operand.vmem [shape: f32[1,32], index: 3, kind: input, shape index: {}]   ;;  %s424_s4 = inlined_call_operand.<no memory space> [shape: f32[1,1], index: 4, kind: input, shape index: {}]   ;;  %s425_s5 = inlined_call_operand.vmem [shape: f32[1,128], index: 5, kind: output, shape index: {}]  }
   0x1   :  { %v38_v0 = vld [vmem:[%s420_s1 + $0x8] sm:$0xff]  ;;  %v37_v1 = vld [vmem:[%s420_s1] sm:$0xff]  ;;  %v27_v2 = vld [vmem:[%s421_s0 + $0x30] sm:$0xff] }
   0x2   :  { %286 = vmatpush.msra.mxu2 %v38_v0  ;;  %287 = vmatpush.msra.mxu3 %v38_v0  ;;  %v34_v3 = vld [vmem:[%s421_s0 + $0x68] sm:$0xff]  ;;  %v28_v4 = vld [vmem:[%s421_s0 + $0x38] sm:$0xff]  ;;  %v35_v5 = vld [vmem:[%s421_s0 + $0x70] sm:$0xff] }
   0x3   :  { %106 = vmatpush.msra.mxu0 %v38_v0  ;;  %v21_v6 = vld [vmem:[%s421_s0] sm:$0xff]  ;;  %v36_v8 = vld [vmem:[%s421_s0 + $0x78] sm:$0xff]  ;;  %v22_v9 = vld [vmem:[%s421_s0 + $0x8] sm:$0xff] }
   0x4   :  { %288 = vmatpush.msra.mxu2 %v37_v1  ;;  %289 = vmatpush.msra.mxu3 %v37_v1  ;;  %v29_v7 = vld [vmem:[%s421_s0 + $0x40] sm:$0xff]  ;;  %v30_v10 = vld [vmem:[%s421_s0 + $0x48] sm:$0xff]  ;;  %v23_v11 = vld [vmem:[%s421_s0 + $0x10] sm:$0xff] }
   0x5   :  { %259 = vmatmul.msk.f32.vlgmr.msra.gmra.mxu2 %vm43_vm0, %v27_v2  ;;  %266 = vmatmul.msk.f32.vlgmr.msra.gmra.mxu3 %vm43_vm0, %v34_v3  ;;  %v31_v12 = vld [vmem:[%s421_s0 + $0x50] sm:$0xff]  ;;  %v24_v13 = vld [vmem:[%s421_s0 + $0x18] sm:$0xff]  ;;  %v25_v15 = vld [vmem:[%s421_s0 + $0x20] sm:$0xff] }
   0x6   :  { %107 = vmatpush.msra.mxu0 %v37_v1  ;;  %v32_v14 = vld [vmem:[%s421_s0 + $0x58] sm:$0xff]  ;;  %v33_v16 = vld [vmem:[%s421_s0 + $0x60] sm:$0xff]  ;;  %v26_v17 = vld [vmem:[%s421_s0 + $0x28] sm:$0xff] }
   0x7   :  { %253 = vmatmul.msk.f32.vlgmr.msra.gmra.mxu0 %vm43_vm0, %v21_v6  ;;  %v290_v18 = vld [vmem:[%s422_s2] ss:$0 sm:$0xff] }
   0x8   :  { %v173_v3 = vld [vmem:[%s423_s3] sm:$0x1] }
   0xd   :  { %260 = vmatmul.msk.f32.gmra.mxu2 %vm43_vm0, %v28_v4  ;;  %267 = vmatmul.msk.f32.gmra.mxu3 %vm43_vm0, %v35_v5  ;;  %v175_v4 = vstv %s424_s4 }
   0xf   :  { %254 = vmatmul.msk.f32.gmra.mxu0 %vm43_vm0, %v22_v9 }
  0x15   :  { %261 = vmatmul.msk.f32.gmra.mxu2 %vm43_vm0, %v29_v7  ;;  %268 = vmatmul.msk.f32.gmra.mxu3 %vm43_vm0, %v36_v8 }
  0x17   :  { %255 = vmatmul.msk.f32.gmra.mxu0 %vm43_vm0, %v23_v11 }
  0x1d   :  { %262 = vmatmul.msk.f32.gmra.mxu2 %vm43_vm0, %v30_v10 }
  0x1f   :  { %256 = vmatmul.msk.f32.gmra.mxu0 %vm43_vm0, %v24_v13 }
  0x25   :  { %263 = vmatmul.msk.f32.gmra.mxu2 %vm43_vm0, %v31_v12 }
  0x27   :  { %257 = vmatmul.msk.f32.gmra.mxu0 %vm43_vm0, %v25_v15 }
  0x2d   :  { %264 = vmatmul.msk.f32.gmra.mxu2 %vm43_vm0, %v32_v14 }
  0x2f   :  { %258 = vmatmul.msk.f32.gmra.mxu0 %vm43_vm0, %v26_v17 }
  0x35   :  { %265 = vmatmul.msk.f32.gmra.mxu2 %vm43_vm0, %v33_v16 }
  0x84   :  { %v109_v29 = vpop.f32.mrf.mxu0 }
  0x85   :  { %v110_v0 = vadd.f32 %v290_v18, %v109_v29 }
  0x87   :  { %v157_v2 = vmax.f32 %v110_v0, 0.0 }
  0x88   :  { %v127_v19 = vpop.f32.mrf.mxu2  ;;  %v148_v20 = vpop.f32.mrf.mxu3 }
  0x89   :  { %v128_v21 = vadd.f32 %v290_v18, %v127_v19  ;;  %v149_v31 = vadd.f32 %v290_v18, %v148_v20 }
  0x8b   :  { %v170_v33 = vmax.f32 %v149_v31, 0.0  ;;  %v163_v55 = vmax.f32 %v128_v21, 0.0 }
  0x8c   :  { %v112_v34 = vpop.f32.mrf.mxu0 }
  0x8d   :  { %v113_v62 = vadd.f32 %v290_v18, %v112_v34 }
  0x8f   :  { %v158_v1 = vmax.f32 %v113_v62, 0.0 }
  0x90   :  { %v130_v22 = vpop.f32.mrf.mxu2  ;;  %v151_v23 = vpop.f32.mrf.mxu3 }
  0x91   :  { %v152_v26 = vadd.f32 %v290_v18, %v151_v23  ;;  %v131_v50 = vadd.f32 %v290_v18, %v130_v22 }
  0x93   :  { %v171_v30 = vmax.f32 %v152_v26, 0.0  ;;  %v164_v53 = vmax.f32 %v131_v50, 0.0 }
  0x94   :  { %v115_v37 = vpop.f32.mrf.mxu0 }
  0x95   :  { %v116_v60 = vadd.f32 %v290_v18, %v115_v37 }
  0x97   :  { %v159_v63 = vmax.f32 %v116_v60, 0.0 }
  0x98   :  { %v133_v24 = vpop.f32.mrf.mxu2  ;;  %v154_v25 = vpop.f32.mrf.mxu3 }
  0x99   :  { %v155_v27 = vadd.f32 %v290_v18, %v154_v25  ;;  %v134_v48 = vadd.f32 %v290_v18, %v133_v24 }
  0x9b   :  { %v172_v28 = vmax.f32 %v155_v27, 0.0  ;;  %v165_v51 = vmax.f32 %v134_v48, 0.0 }
  0x9c   :  { %v118_v40 = vpop.f32.mrf.mxu0 }
  0x9d   :  { %269 = vmatpush.xpose.msk.msra.mxu1 %vm176_vm1, %v172_v28  ;;  %v119_v58 = vadd.f32 %v290_v18, %v118_v40 }
  0x9f   :  { %v160_v61 = vmax.f32 %v119_v58, 0.0 }
  0xa0   :  { %v136_v32 = vpop.f32.mrf.mxu2 }
  0xa1   :  { %270 = vmatpush.xpose.msk.msra.mxu1 %vm176_vm1, %v171_v30  ;;  %v137_v45 = vadd.f32 %v290_v18, %v136_v32 }
  0xa3   :  { %v166_v49 = vmax.f32 %v137_v45, 0.0 }
  0xa4   :  { %v121_v47 = vpop.f32.mrf.mxu0 }
  0xa5   :  { %271 = vmatpush.xpose.msk.msra.mxu1 %vm176_vm1, %v170_v33  ;;  %v122_v57 = vadd.f32 %v290_v18, %v121_v47 }
  0xa7   :  { %v161_v59 = vmax.f32 %v122_v57, 0.0 }
  0xa8   :  { %v139_v35 = vpop.f32.mrf.mxu2 }
  0xa9   :  { %v140_v43 = vadd.f32 %v290_v18, %v139_v35 }
  0xab   :  { %v167_v46 = vmax.f32 %v140_v43, 0.0 }
  0xac   :  { %v124_v52 = vpop.f32.mrf.mxu0 }
  0xad   :  { %v125_v54 = vadd.f32 %v290_v18, %v124_v52 }
  0xaf   :  { %v162_v56 = vmax.f32 %v125_v54, 0.0 }
  0xb0   :  { %v142_v36 = vpop.f32.mrf.mxu2 }
  0xb1   :  { %v143_v41 = vadd.f32 %v290_v18, %v142_v36 }
  0xb3   :  { %v168_v44 = vmax.f32 %v143_v41, 0.0 }
  0xb8   :  { %v145_v38 = vpop.f32.mrf.mxu2 }
  0xb9   :  { %v146_v39 = vadd.f32 %v290_v18, %v145_v38 }
  0xbb   :  { %v169_v42 = vmax.f32 %v146_v39, 0.0 }
  0xbd   :  { %272 = vmatpush.xpose.msk.msra.mxu1 %vm176_vm1, %v169_v42 }
  0xc1   :  { %273 = vmatpush.xpose.msk.msra.mxu1 %vm176_vm1, %v168_v44 }
  0xc5   :  { %274 = vmatpush.xpose.msk.msra.mxu1 %vm176_vm1, %v167_v46 }
  0xc9   :  { %275 = vmatpush.xpose.msk.msra.mxu1 %vm176_vm1, %v166_v49 }
  0xcd   :  { %276 = vmatpush.xpose.msk.msra.mxu1 %vm176_vm1, %v165_v51 }
  0xd1   :  { %277 = vmatpush.xpose.msk.msra.mxu1 %vm176_vm1, %v164_v53 }
  0xd5   :  { %278 = vmatpush.xpose.msk.msra.mxu1 %vm176_vm1, %v163_v55 }
  0xd9   :  { %279 = vmatpush.xpose.msk.msra.mxu1 %vm176_vm1, %v162_v56 }
  0xdd   :  { %280 = vmatpush.xpose.msk.msra.mxu1 %vm176_vm1, %v161_v59 }
  0xe1   :  { %281 = vmatpush.xpose.msk.msra.mxu1 %vm176_vm1, %v160_v61 }
  0xe5   :  { %282 = vmatpush.xpose.msk.msra.mxu1 %vm176_vm1, %v159_v63 }
  0xe9   :  { %283 = vmatpush.xpose.msk.msra.mxu1 %vm176_vm1, %v158_v1 }
  0xed   :  { %284 = vmatpush.xpose.msk.msra.mxu1 %vm176_vm1, %v157_v2 }
  0xf0   :  { %285 = vmatmul.msk.f32.vlgmr.msra.gmra.mxu1 %vm176_vm1, %v173_v3 }
 0x16d   :  { %v245_v5 = vpop.f32.mrf.mxu1 }
 0x16e   :  { %v246_v6 = vadd.f32 %v245_v5, %v175_v4 }
 0x170   :  { %248 = vst [vmem:[%s425_s5] sm:$0x1] %v246_v6 }

</bundles_post_ra>
